<compile_context>
chip_gen: v6e
topology: v6e:2x2x1
jax: 0.10.0
libtpu: 0.0.40
codegen_flags: <defaults>
</compile_context>

<pallas_src>
import functools

import jax
import jax.numpy as jnp
from jax import lax
from jax.experimental import pallas as pl
from jax.experimental.pallas import tpu as pltpu


def _gram_kernel(x_ref, o_ref, *, precision=None):
    # x_ref: (BB, R, K) VMEM tile; o_ref: (BB, R, R) VMEM tile.
    xb = x_ref[...]
    # Batched contraction over K (last axis of both operands). The MXU
    # consumes x as both LHS and RHS — no transpose is ever materialized.
    g = lax.dot_general(
        xb,
        xb,
        dimension_numbers=(((2,), (2,)), ((0,), (0,))),
        precision=precision,
        preferred_element_type=jnp.float32,
    )
    o_ref[...] = g.astype(o_ref.dtype)


@functools.lru_cache(maxsize=1)
def _tpu_hw():
    """(physical VMEM bytes, #TensorCores per chip), generation-aware."""
    vmem_bytes = 128 * 1024 * 1024  # v4/v5e/v6e
    num_tc = 1
    try:
        kind = jax.devices()[0].device_kind.lower()
    except Exception:
        kind = ""
    if "v7" in kind:
        vmem_bytes = 64 * 1024 * 1024
        num_tc = 2
    try:
        info = pltpu.get_tpu_info()
        vmem_bytes = int(getattr(info, "vmem_capacity_bytes", vmem_bytes))
    except Exception:
        pass  # fall back to the device_kind heuristic
    return vmem_bytes, num_tc


def _round_up(n, m):
    return ((n + m - 1) // m) * m


def _pick_batch_block(B, R, K, in_itemsize, out_itemsize, budget_bytes, num_tc):
    """Largest divisor of B whose double-buffered tile fits the VMEM budget.

    Choosing a divisor of B means no batch padding and no post-slice, i.e. no
    extra HBM passes outside the kernel.  On chips with 2 TensorCores (v7x)
    the step count is made even — but only when each step still moves enough
    bytes (>=512 KiB) to amortize the ~0.35 us per-step overhead.
    """
    per_batch_hbm = R * K * in_itemsize + R * R * out_itemsize
    per_batch_vmem = 2 * per_batch_hbm  # double-buffered in/out
    bb_cap = max(1, int(budget_bytes // max(per_batch_vmem, 1)))
    bb_cap = min(bb_cap, B)

    bb = 1
    for d in range(bb_cap, 0, -1):
        if B % d == 0:
            bb = d
            break

    if num_tc >= 2 and B >= 2:
        min_step_bytes = 512 * 1024
        n_steps = B // bb
        if n_steps % 2 != 0:
            for d in range(bb, 0, -1):
                if B % d == 0 and (B // d) % 2 == 0 and d * per_batch_hbm >= min_step_bytes:
                    bb = d
                    break
    return bb


@functools.partial(
    jax.jit, static_argnames=("use_bf16_matmul", "use_bf16_out", "precision")
)
def embed2graph_by_product(x, use_bf16_matmul=False, use_bf16_out=False,
                           precision=None):
    """x: (B, R, K) -> (B, R, R, 1); matches torch.einsum('ijk,ipk->ijp')[..., None]."""
    B, R, K = x.shape
    out_dtype = jnp.bfloat16 if use_bf16_out else x.dtype

    # Optional bf16 input path (f32 accumulation). Note: this only halves the
    # small R*K input stream; the R*R output dominates when K << R, which is
    # what use_bf16_out addresses. Both are opt-in to keep exact f32 defaults.
    xk = x.astype(jnp.bfloat16) if use_bf16_matmul else x

    # Lane-dense padding of R (biggest single lever on the R^2 writeback).
    # Zero rows contribute zero gram entries, so results are unchanged.
    Rp = _round_up(R, 128) if (R % 128 != 0) else R
    if Rp != R:
        xk = jnp.pad(xk, ((0, 0), (0, Rp - R), (0, 0)))

    in_itemsize = jnp.dtype(xk.dtype).itemsize
    out_itemsize = jnp.dtype(out_dtype).itemsize

    vmem_capacity, num_tc = _tpu_hw()
    budget = vmem_capacity // 2                       # ~64 MiB v5e/v6e, ~32 MiB v7x
    vmem_limit = int(min(vmem_capacity * 3 // 4, budget + (16 << 20)))

    BB = _pick_batch_block(B, Rp, K, in_itemsize, out_itemsize, budget, num_tc)
    n_steps = B // BB  # BB divides B by construction — no pad, no slice.

    cost = pl.CostEstimate(
        flops=2 * B * Rp * Rp * K,
        transcendentals=0,
        bytes_accessed=B * (Rp * K * in_itemsize + Rp * Rp * out_itemsize),
    )

    m = pl.pallas_call(
        functools.partial(_gram_kernel, precision=precision),
        out_shape=jax.ShapeDtypeStruct((B, Rp, Rp), out_dtype),
        grid_spec=pltpu.PrefetchScalarGridSpec(
            num_scalar_prefetch=0,
            grid=(n_steps,),
            in_specs=[pl.BlockSpec((BB, Rp, K), lambda b: (b, 0, 0))],
            out_specs=pl.BlockSpec((BB, Rp, Rp), lambda b: (b, 0, 0)),
        ),
        compiler_params=pltpu.CompilerParams(
            dimension_semantics=("parallel",),
            vmem_limit_bytes=vmem_limit,
        ),
        cost_estimate=cost,
    )(xk)

    if Rp != R:
        m = m[:, :R, :R]
    # Trailing unsqueeze stays OUTSIDE the kernel: a size-1 last block dim
    # would force masked partial stores on the dominant R^2 writeback stream.
    # Under jit this reshape is metadata-only.
    return m[..., None]


if __name__ == "__main__":
    # Small shapes consistent with the module: batch=2, roi_num=128, input_dim=32.
    B, R, K = 2, 128, 32
    key = jax.random.PRNGKey(0)
    x = jax.random.normal(key, (B, R, K), dtype=jnp.float32)

    out = embed2graph_by_product(x)
    out = jax.block_until_ready(out)

    # Reference check against plain JAX einsum (same semantics as torch.einsum).
    ref = jnp.einsum("ijk,ipk->ijp", x, x)[..., None]
    assert out.shape == (B, R, R, 1), out.shape
    assert jnp.allclose(out, ref, atol=1e-4, rtol=1e-4), "mismatch vs reference"

    print("KERNEL_OK")
</pallas_src>

<mosaic_0001>
module attributes {stable_mosaic.version = 11 : i64} {
  func.func @_gram_kernel(%arg0: i32, %arg1: memref<2x128x32xf32, #tpu.memory_space<vmem>>, %arg2: memref<2x128x128xf32, #tpu.memory_space<vmem>>) attributes {dimension_semantics = [#tpu.dimension_semantics<parallel>], iteration_bounds = array<i64: 1>, scalar_prefetch = 0 : i64, scratch_operands = 0 : i64, tpu.core_type = #tpu.core_type<tc>, window_params = [{transform_indices = @transform_0, window_bounds = array<i64: 2, 128, 32>}, {transform_indices = @transform_1, window_bounds = array<i64: 2, 128, 128>}]} {
    %c0 = arith.constant 0 : index
    %c0_0 = arith.constant 0 : index
    %c0_1 = arith.constant 0 : index
    %0 = vector.load %arg1[%c0, %c0_0, %c0_1] : memref<2x128x32xf32, #tpu.memory_space<vmem>>, vector<2x128x32xf32>
    %cst = arith.constant dense<0.000000e+00> : vector<2x128x128xf32>
    %1 = tpu.matmul %0, %0, %cst {dimension_numbers = #tpu.dot_dimension_numbers<[2], [2], [1], [1], [0, 0, 0, 1, 1, 1], [0], [0]>} : vector<2x128x32xf32>, vector<2x128x32xf32>, vector<2x128x128xf32> -> vector<2x128x128xf32>
    %c0_2 = arith.constant 0 : index
    %c0_3 = arith.constant 0 : index
    %c0_4 = arith.constant 0 : index
    %2 = vector.load %arg2[%c0_2, %c0_3, %c0_4] : memref<2x128x128xf32, #tpu.memory_space<vmem>>, vector<2x128x128xf32>
    tpu.vector_store %arg2[%c0_2, %c0_3, %c0_4], %1 {strides = array<i32>} : memref<2x128x128xf32, #tpu.memory_space<vmem>>, vector<2x128x128xf32>,
    return
  }
  func.func @transform_0(%arg0: i32) -> (i32, i32, i32) {
    %c0_i32 = arith.constant 0 : i32
    %c0_i32_0 = arith.constant 0 : i32
    %c0_i32_1 = arith.constant 0 : i32
    return %arg0, %c0_i32, %c0_i32_0 : i32, i32, i32
  }
  func.func @transform_1(%arg0: i32) -> (i32, i32, i32) {
    %c0_i32 = arith.constant 0 : i32
    %c0_i32_0 = arith.constant 0 : i32
    %c0_i32_1 = arith.constant 0 : i32
    return %arg0, %c0_i32, %c0_i32_0 : i32, i32, i32
  }
}

</mosaic_0001>

<bundles_post_ra>
// kernel: embed2graph_by_product.1
= control target key start
LH: loop header
LB: loop body
LE: loop exit
PB: predicated region body
PF: predicated region fallthrough
CT: control target
= control target key end

     0   :  { %vm41_vm0 = vcmask 261120   ;;  %s1039_s0 = inlined_call_operand.vmem [shape: f32[2,128,32], index: 0, kind: input, shape index: {}]   ;;  %s1040_s1 = inlined_call_operand.hbm [shape: f32[2,128,128], index: 1, kind: output, shape index: {}]  }
   0x1   :  { %v757_v0 = vld [vmem:[%s1039_s0 + $0x78] sm:$0xff]  ;;  %v767_v2 = vld [vmem:[%s1039_s0 + $0x70] sm:$0xff]  ;;  %v789_v4 = vld [vmem:[%s1039_s0 + $0x68] sm:$0xff] }
   0x2   :  { %v762_v1 = vld [vmem:[%s1039_s0 + $0xf8] sm:$0xff]  ;;  %604 = vmatprep.subr.msk.mxu0 %vm41_vm0, %v757_v0  ;;  %v776_v3 = vld [vmem:[%s1039_s0 + $0xf0] sm:$0xff]  ;;  %v794_v5 = vld [vmem:[%s1039_s0 + $0xe8] sm:$0xff] }
   0x3   :  { %660 = vmatprep.subr.msk.mxu1 %vm41_vm0, %v762_v1  ;;  %605 = vmatpush3.xpose.msk.msra.mxu0 %vm41_vm0, %v757_v0  ;;  %v807_v6 = vld [vmem:[%s1039_s0 + $0x60] sm:$0xff] }
   0x4   :  { %661 = vmatpush3.xpose.msk.msra.mxu1 %vm41_vm0, %v762_v1  ;;  %606 = vmatprep.subr.msk.mxu0 %vm41_vm0, %v767_v2  ;;  %v812_v7 = vld [vmem:[%s1039_s0 + $0xe0] sm:$0xff] }
   0x5   :  { %662 = vmatprep.subr.msk.mxu1 %vm41_vm0, %v776_v3 }
   0x7   :  { %607 = vmatpush3.xpose.msk.msra.mxu0 %vm41_vm0, %v767_v2 }
   0x8   :  { %663 = vmatpush3.xpose.msk.msra.mxu1 %vm41_vm0, %v776_v3  ;;  %608 = vmatprep.subr.msk.mxu0 %vm41_vm0, %v789_v4 }
   0x9   :  { %664 = vmatprep.subr.msk.mxu1 %vm41_vm0, %v794_v5 }
   0xb   :  { %609 = vmatpush3.xpose.msk.msra.mxu0 %vm41_vm0, %v789_v4 }
   0xc   :  { %665 = vmatpush3.xpose.msk.msra.mxu1 %vm41_vm0, %v794_v5 }
   0xd   :  { %6 = vsyncpa [#allocation3], 0  ;;  %610 = vmatprep.subr.msk.mxu0 %vm41_vm0, %v807_v6  ;;  %666 = vmatprep.subr.msk.mxu1 %vm41_vm0, %v812_v7  ;;  %v825_v8 = vld [vmem:[%s1039_s0] sm:$0xff]  ;;  %v835_v10 = vld [vmem:[%s1039_s0 + $0x58] sm:$0xff] }
   0xe   :  { %v830_v9 = vld [vmem:[%s1039_s0 + $0x80] sm:$0xff]  ;;  %v840_v11 = vld [vmem:[%s1039_s0 + $0xd8] sm:$0xff]  ;;  %636 = vmatprep.mubr.msk.f32.mxu0 %vm41_vm0, %v825_v8  ;;  %v857_v12 = vld [vmem:[%s1039_s0 + $0x50] sm:$0xff] }
   0xf   :  { %692 = vmatprep.mubr.msk.f32.mxu1 %vm41_vm0, %v830_v9  ;;  %611 = vmatpush3.xpose.msk.msra.mxu0 %vm41_vm0, %v807_v6  ;;  %v862_v13 = vld [vmem:[%s1039_s0 + $0xd0] sm:$0xff]  ;;  %v875_v14 = vld [vmem:[%s1039_s0 + $0x48] sm:$0xff]  ;;  %v893_v16 = vld [vmem:[%s1039_s0 + $0x40] sm:$0xff] }
  0x10   :  { %667 = vmatpush3.xpose.msk.msra.mxu1 %vm41_vm0, %v812_v7  ;;  %612 = vmatprep.subr.msk.mxu0 %vm41_vm0, %v835_v10  ;;  %v880_v15 = vld [vmem:[%s1039_s0 + $0xc8] sm:$0xff]  ;;  %v898_v17 = vld [vmem:[%s1039_s0 + $0xc0] sm:$0xff]  ;;  %v16_v18 = vld [vmem:[%s1039_s0 + $0x38] sm:$0xff] }
  0x11   :  { %668 = vmatprep.subr.msk.mxu1 %vm41_vm0, %v840_v11  ;;  %v32_v19 = vld [vmem:[%s1039_s0 + $0xb8] sm:$0xff]  ;;  %v15_v20 = vld [vmem:[%s1039_s0 + $0x30] sm:$0xff]  ;;  %v14_v22 = vld [vmem:[%s1039_s0 + $0x28] sm:$0xff] }
  0x12   :  { %v31_v21 = vld [vmem:[%s1039_s0 + $0xb0] sm:$0xff]  ;;  %v30_v23 = vld [vmem:[%s1039_s0 + $0xa8] sm:$0xff]  ;;  %v13_v24 = vld [vmem:[%s1039_s0 + $0x20] sm:$0xff] }
  0x13   :  { %613 = vmatpush3.xpose.msk.msra.mxu0 %vm41_vm0, %v835_v10  ;;  %v29_v25 = vld [vmem:[%s1039_s0 + $0xa0] sm:$0xff]  ;;  %v12_v26 = vld [vmem:[%s1039_s0 + $0x18] sm:$0xff]  ;;  %v11_v28 = vld [vmem:[%s1039_s0 + $0x10] sm:$0xff] }
  0x14   :  { %669 = vmatpush3.xpose.msk.msra.mxu1 %vm41_vm0, %v840_v11  ;;  %614 = vmatprep.subr.msk.mxu0 %vm41_vm0, %v857_v12  ;;  %v28_v27 = vld [vmem:[%s1039_s0 + $0x98] sm:$0xff]  ;;  %v27_v29 = vld [vmem:[%s1039_s0 + $0x90] sm:$0xff]  ;;  %v10_v30 = vld [vmem:[%s1039_s0 + $0x8] sm:$0xff] }
  0x15   :  { %670 = vmatprep.subr.msk.mxu1 %vm41_vm0, %v862_v13  ;;  %v26_v31 = vld [vmem:[%s1039_s0 + $0x88] sm:$0xff]  ;;  %s741_s0 = smov [#allocation2]  }
  0x16   :  { %s465_s12 = sshll.u32 %s741_s0, 4  ;;  %s466_s12 = int_to_ptr.vmem [resolvable:$true] %s465_s12 }
  0x17   :  { %615 = vmatpush3.xpose.msk.msra.mxu0 %vm41_vm0, %v857_v12  ;;  %s719_s13 = scalar_lea.vmem %s466_s12, 4096  ;;  %p724_p1 = scmp.lt.s32.totalorder %s466_s12, %s466_s12 }
  0x18   :  { %671 = vmatpush3.xpose.msk.msra.mxu1 %vm41_vm0, %v862_v13  ;;  %616 = vmatprep.subr.msk.mxu0 %vm41_vm0, %v875_v14  ;;  %p720_p0 = scmp.ne.s32.totalorder %s466_s12, %s719_s13  ;;  %p725_p2 = scmp.lt.s32.totalorder %s719_s13, %s719_s13 }
  0x19   :  { %672 = vmatprep.subr.msk.mxu1 %vm41_vm0, %v880_v15 }
  0x1a   :  { %p726_p3 = por %p725_p2, %p724_p1 }
  0x1b   :  { %617 = vmatpush3.xpose.msk.msra.mxu0 %vm41_vm0, %v875_v14 }
  0x1c   :  { %673 = vmatpush3.xpose.msk.msra.mxu1 %vm41_vm0, %v880_v15  ;;  %618 = vmatprep.subr.msk.mxu0 %vm41_vm0, %v893_v16  ;;  %p727_p4 = pnand %p726_p3, %p720_p0 }
  0x1d   :  { %674 = vmatprep.subr.msk.mxu1 %vm41_vm0, %v898_v17 }
  0x1f   :  { %619 = vmatpush3.xpose.msk.msra.mxu0 %vm41_vm0, %v893_v16 }
  0x20   :  { %675 = vmatpush3.xpose.msk.msra.mxu1 %vm41_vm0, %v898_v17  ;;  %620 = vmatprep.subr.msk.mxu0 %vm41_vm0, %v16_v18 }
  0x21   :  { %676 = vmatprep.subr.msk.mxu1 %vm41_vm0, %v32_v19 }
  0x23   :  { %621 = vmatpush3.xpose.msk.msra.mxu0 %vm41_vm0, %v16_v18 }
  0x24   :  { %677 = vmatpush3.xpose.msk.msra.mxu1 %vm41_vm0, %v32_v19  ;;  %622 = vmatprep.subr.msk.mxu0 %vm41_vm0, %v15_v20 }
  0x25   :  { %678 = vmatprep.subr.msk.mxu1 %vm41_vm0, %v31_v21 }
  0x27   :  { %623 = vmatpush3.xpose.msk.msra.mxu0 %vm41_vm0, %v15_v20 }
  0x28   :  { %679 = vmatpush3.xpose.msk.msra.mxu1 %vm41_vm0, %v31_v21  ;;  %624 = vmatprep.subr.msk.mxu0 %vm41_vm0, %v14_v22 }
  0x29   :  { %680 = vmatprep.subr.msk.mxu1 %vm41_vm0, %v30_v23 }
  0x2b   :  { %625 = vmatpush3.xpose.msk.msra.mxu0 %vm41_vm0, %v14_v22 }
  0x2c   :  { %681 = vmatpush3.xpose.msk.msra.mxu1 %vm41_vm0, %v30_v23  ;;  %626 = vmatprep.subr.msk.mxu0 %vm41_vm0, %v13_v24 }
  0x2d   :  { %682 = vmatprep.subr.msk.mxu1 %vm41_vm0, %v29_v25 }
  0x2f   :  { %627 = vmatpush3.xpose.msk.msra.mxu0 %vm41_vm0, %v13_v24 }
  0x30   :  { %683 = vmatpush3.xpose.msk.msra.mxu1 %vm41_vm0, %v29_v25  ;;  %628 = vmatprep.subr.msk.mxu0 %vm41_vm0, %v12_v26 }
  0x31   :  { %684 = vmatprep.subr.msk.mxu1 %vm41_vm0, %v28_v27 }
  0x33   :  { %629 = vmatpush3.xpose.msk.msra.mxu0 %vm41_vm0, %v12_v26 }
  0x34   :  { %685 = vmatpush3.xpose.msk.msra.mxu1 %vm41_vm0, %v28_v27  ;;  %630 = vmatprep.subr.msk.mxu0 %vm41_vm0, %v11_v28 }
  0x35   :  { %686 = vmatprep.subr.msk.mxu1 %vm41_vm0, %v27_v29 }
  0x37   :  { %631 = vmatpush3.xpose.msk.msra.mxu0 %vm41_vm0, %v11_v28 }
  0x38   :  { %687 = vmatpush3.xpose.msk.msra.mxu1 %vm41_vm0, %v27_v29  ;;  %632 = vmatprep.subr.msk.mxu0 %vm41_vm0, %v10_v30 }
  0x39   :  { %688 = vmatprep.subr.msk.mxu1 %vm41_vm0, %v26_v31 }
  0x3b   :  { %633 = vmatpush3.xpose.msk.msra.mxu0 %vm41_vm0, %v10_v30 }
  0x3c   :  { %689 = vmatpush3.xpose.msk.msra.mxu1 %vm41_vm0, %v26_v31  ;;  %634 = vmatprep.subr.msk.mxu0 %vm41_vm0, %v825_v8 }
  0x3d   :  { %690 = vmatprep.subr.msk.mxu1 %vm41_vm0, %v830_v9 }
  0x3f   :  { %635 = vmatpush3.xpose.msk.msra.mxu0 %vm41_vm0, %v825_v8 }
  0x40   :  { %691 = vmatpush3.xpose.msk.msra.mxu1 %vm41_vm0, %v830_v9 }
  0x42   :  { %637 = vmatmul.mubr.msk.f32.vlgmr.msra.gmra.mxu0 %vm41_vm0, %v10_v30 }
  0x43   :  { %693 = vmatmul.mubr.msk.f32.vlgmr.msra.gmra.mxu1 %vm41_vm0, %v26_v31  ;;  %639 = vmatprep.mubr.msk.f32.mxu0 %vm41_vm0, %v11_v28 }
  0x44   :  { %695 = vmatprep.mubr.msk.f32.mxu1 %vm41_vm0, %v27_v29 }
  0x46   :  { %640 = vmatmul.mubr.msk.f32.gmra.mxu0 %vm41_vm0, %v12_v26 }
  0x47   :  { %696 = vmatmul.mubr.msk.f32.gmra.mxu1 %vm41_vm0, %v28_v27  ;;  %642 = vmatprep.mubr.msk.f32.mxu0 %vm41_vm0, %v13_v24 }
  0x48   :  { %698 = vmatprep.mubr.msk.f32.mxu1 %vm41_vm0, %v29_v25 }
  0x4a   :  { %643 = vmatmul.mubr.msk.f32.gmra.mxu0 %vm41_vm0, %v14_v22 }
  0x4b   :  { %699 = vmatmul.mubr.msk.f32.gmra.mxu1 %vm41_vm0, %v30_v23  ;;  %645 = vmatprep.mubr.msk.f32.mxu0 %vm41_vm0, %v15_v20 }
  0x4c   :  { %701 = vmatprep.mubr.msk.f32.mxu1 %vm41_vm0, %v31_v21 }
  0x4e   :  { %646 = vmatmul.mubr.msk.f32.gmra.mxu0 %vm41_vm0, %v16_v18 }
  0x4f   :  { %702 = vmatmul.mubr.msk.f32.gmra.mxu1 %vm41_vm0, %v32_v19  ;;  %648 = vmatprep.mubr.msk.f32.mxu0 %vm41_vm0, %v893_v16 }
  0x50   :  { %704 = vmatprep.mubr.msk.f32.mxu1 %vm41_vm0, %v898_v17 }
  0x52   :  { %649 = vmatmul.mubr.msk.f32.gmra.mxu0 %vm41_vm0, %v875_v14 }
  0x53   :  { %705 = vmatmul.mubr.msk.f32.gmra.mxu1 %vm41_vm0, %v880_v15  ;;  %651 = vmatprep.mubr.msk.f32.mxu0 %vm41_vm0, %v857_v12 }
  0x54   :  { %707 = vmatprep.mubr.msk.f32.mxu1 %vm41_vm0, %v862_v13 }
  0x56   :  { %652 = vmatmul.mubr.msk.f32.gmra.mxu0 %vm41_vm0, %v835_v10 }
  0x57   :  { %708 = vmatmul.mubr.msk.f32.gmra.mxu1 %vm41_vm0, %v840_v11  ;;  %654 = vmatprep.mubr.msk.f32.mxu0 %vm41_vm0, %v807_v6 }
  0x58   :  { %710 = vmatprep.mubr.msk.f32.mxu1 %vm41_vm0, %v812_v7 }
  0x5a   :  { %655 = vmatmul.mubr.msk.f32.gmra.mxu0 %vm41_vm0, %v789_v4 }
  0x5b   :  { %711 = vmatmul.mubr.msk.f32.gmra.mxu1 %vm41_vm0, %v794_v5  ;;  %657 = vmatprep.mubr.msk.f32.mxu0 %vm41_vm0, %v767_v2 }
  0x5c   :  { %713 = vmatprep.mubr.msk.f32.mxu1 %vm41_vm0, %v776_v3 }
  0x5e   :  { %658 = vmatmul.mubr.msk.f32.gmra.mxu0 %vm41_vm0, %v757_v0 }
  0x5f   :  { %714 = vmatmul.mubr.msk.f32.gmra.mxu1 %vm41_vm0, %v762_v1 }
 0x102   :  { %v638_v32 = vpop.f32.mrf.mxu0 }
 0x103   :  { %v694_v33 = vpop.f32.mrf.mxu1  ;;  %429 = vst [vmem:[#allocation2 + $0x8] sm:$0xff] %v638_v32 }
 0x104   :  { %445 = vst [vmem:[#allocation2 + $0x88] sm:$0xff] %v694_v33  ;;  %v156_v34 = vpop.f32.mrf.mxu0 }
 0x105   :  { %v349_v35 = vpop.f32.mrf.mxu1  ;;  %428 = vst [vmem:[#allocation2] sm:$0xff] %v156_v34 }
 0x106   :  { %444 = vst [vmem:[#allocation2 + $0x80] sm:$0xff] %v349_v35  ;;  %v641_v36 = vpop.f32.mrf.mxu0 }
 0x107   :  { %v697_v37 = vpop.f32.mrf.mxu1  ;;  %431 = vst [vmem:[#allocation2 + $0x18] sm:$0xff] %v641_v36 }
 0x108   :  { %447 = vst [vmem:[#allocation2 + $0x98] sm:$0xff] %v697_v37  ;;  %v166_v38 = vpop.f32.mrf.mxu0 }
 0x109   :  { %v359_v39 = vpop.f32.mrf.mxu1  ;;  %430 = vst [vmem:[#allocation2 + $0x10] sm:$0xff] %v166_v38 }
 0x10a   :  { %446 = vst [vmem:[#allocation2 + $0x90] sm:$0xff] %v359_v39  ;;  %v644_v40 = vpop.f32.mrf.mxu0 }
 0x10b   :  { %v700_v41 = vpop.f32.mrf.mxu1  ;;  %433 = vst [vmem:[#allocation2 + $0x28] sm:$0xff] %v644_v40 }
 0x10c   :  { %449 = vst [vmem:[#allocation2 + $0xa8] sm:$0xff] %v700_v41  ;;  %v176_v42 = vpop.f32.mrf.mxu0 }
 0x10d   :  { %v369_v43 = vpop.f32.mrf.mxu1  ;;  %432 = vst [vmem:[#allocation2 + $0x20] sm:$0xff] %v176_v42 }
 0x10e   :  { %448 = vst [vmem:[#allocation2 + $0xa0] sm:$0xff] %v369_v43  ;;  %v647_v44 = vpop.f32.mrf.mxu0 }
 0x10f   :  { %v703_v45 = vpop.f32.mrf.mxu1  ;;  %435 = vst [vmem:[#allocation2 + $0x38] sm:$0xff] %v647_v44 }
 0x110   :  { %451 = vst [vmem:[#allocation2 + $0xb8] sm:$0xff] %v703_v45  ;;  %v186_v46 = vpop.f32.mrf.mxu0 }
 0x111   :  { %v379_v47 = vpop.f32.mrf.mxu1  ;;  %434 = vst [vmem:[#allocation2 + $0x30] sm:$0xff] %v186_v46 }
 0x112   :  { %450 = vst [vmem:[#allocation2 + $0xb0] sm:$0xff] %v379_v47  ;;  %v650_v48 = vpop.f32.mrf.mxu0 }
 0x113   :  { %v706_v49 = vpop.f32.mrf.mxu1  ;;  %437 = vst [vmem:[#allocation2 + $0x48] sm:$0xff] %v650_v48 }
 0x114   :  { %453 = vst [vmem:[#allocation2 + $0xc8] sm:$0xff] %v706_v49  ;;  %v196_v50 = vpop.f32.mrf.mxu0 }
 0x115   :  { %v389_v51 = vpop.f32.mrf.mxu1  ;;  %436 = vst [vmem:[#allocation2 + $0x40] sm:$0xff] %v196_v50 }
 0x116   :  { %452 = vst [vmem:[#allocation2 + $0xc0] sm:$0xff] %v389_v51  ;;  %v653_v52 = vpop.f32.mrf.mxu0 }
 0x117   :  { %v709_v53 = vpop.f32.mrf.mxu1  ;;  %439 = vst [vmem:[#allocation2 + $0x58] sm:$0xff] %v653_v52 }
 0x118   :  { %455 = vst [vmem:[#allocation2 + $0xd8] sm:$0xff] %v709_v53  ;;  %v206_v54 = vpop.f32.mrf.mxu0 }
 0x119   :  { %v399_v55 = vpop.f32.mrf.mxu1  ;;  %438 = vst [vmem:[#allocation2 + $0x50] sm:$0xff] %v206_v54 }
 0x11a   :  { %454 = vst [vmem:[#allocation2 + $0xd0] sm:$0xff] %v399_v55  ;;  %v656_v56 = vpop.f32.mrf.mxu0 }
 0x11b   :  { %v712_v57 = vpop.f32.mrf.mxu1  ;;  %441 = vst [vmem:[#allocation2 + $0x68] sm:$0xff] %v656_v56 }
 0x11c   :  { %457 = vst [vmem:[#allocation2 + $0xe8] sm:$0xff] %v712_v57  ;;  %v216_v58 = vpop.f32.mrf.mxu0 }
 0x11d   :  { %v409_v59 = vpop.f32.mrf.mxu1  ;;  %440 = vst [vmem:[#allocation2 + $0x60] sm:$0xff] %v216_v58 }
 0x11e   :  { %456 = vst [vmem:[#allocation2 + $0xe0] sm:$0xff] %v409_v59  ;;  %v659_v60 = vpop.f32.mrf.mxu0 }
 0x11f   :  { %v715_v61 = vpop.f32.mrf.mxu1  ;;  %443 = vst [vmem:[#allocation2 + $0x78] sm:$0xff] %v659_v60 }
 0x120   :  { %459 = vst [vmem:[#allocation2 + $0xf8] sm:$0xff] %v715_v61  ;;  %v226_v62 = vpop.f32.mrf.mxu0 }
 0x121   :  { %v419_v63 = vpop.f32.mrf.mxu1  ;;  %442 = vst [vmem:[#allocation2 + $0x70] sm:$0xff] %v226_v62 }
 0x122   :  { %458 = vst [vmem:[#allocation2 + $0xf0] sm:$0xff] %v419_v63 }
 0x123   :  { %730 = shalt.err (!%p727_p4)
}
 0x124   :  { %s742_s14 = smov 128   ;;  %s743_s15 = smov 8  }
 0x125   :  { %471 = dma.vmem_to_hbm [thread:$0]  %s466_s12, 4096, %s1040_s1, [#allocation3], %s742_s14, %s742_s14, %s743_s15  }
 0x126   :  { %739 = dma.done.wait [#allocation3], 4096  }
 0x127   :  { %740 = vsyncadd [#allocation3], 4294963200 }
 0x128   :  { %475 = vsyncpa [#allocation3], 1 }

</bundles_post_ra>
